<compile_context>
chip_gen: v6e
topology: v6e:2x2x1
jax: 0.10.0
libtpu: 0.0.40
codegen_flags: <defaults>
</compile_context>

<pallas_src>
import jax
import jax.numpy as jnp
import numpy as np
from jax.experimental import pallas as pl
from jax.experimental.pallas import tpu as pltpu


# --------------------------------------------------------------------------- #
# Kernel
# --------------------------------------------------------------------------- #
def _rotary_flat_kernel(t_ref, cs_ref, o_ref):
    """Lane-dense interleaved rotary on a (TR, TW) tile of (B*H, S*D).

    cs_ref is a (3, TW) stripe [cos; sin_e; sin_o] with the rotate_half sign,
    the interleaved even/odd structure and the pass-through tail already
    folded in:
        out[j] = x[j]*cos[j] + x[j+1]*sin_e[j] + x[j-1]*sin_o[j]
    (two XLU rolls + three FMAs; no iota / compare / select in the kernel).
    """
    x = t_ref[...].astype(jnp.float32)            # (TR, TW)
    cs = cs_ref[...].astype(jnp.float32)          # (3, TW)
    w = x.shape[-1]
    nbr_right = pltpu.roll(x, w - 1, 1)           # nbr_right[j] = x[(j + 1) % w]
    nbr_left = pltpu.roll(x, 1, 1)                # nbr_left[j]  = x[(j - 1) % w]
    out = x * cs[0:1, :] + nbr_right * cs[1:2, :] + nbr_left * cs[2:3, :]
    o_ref[...] = out.astype(o_ref.dtype)


# --------------------------------------------------------------------------- #
# Tiling helpers + pallas_call wrapper
# --------------------------------------------------------------------------- #
def _divisor_tile(total, max_tile, quantum):
    """Largest multiple of `quantum` that divides `total` and is <= max_tile
    (but at least `quantum`).  Returns `total` when no legal smaller tile
    exists (total not a multiple of quantum, or total <= quantum)."""
    if total % quantum != 0 or total <= quantum:
        return total
    tile = max(quantum, min(total, (max_tile // quantum) * quantum))
    while total % tile != 0:
        tile -= quantum
    return tile


def _rotary_pallas(t_flat, cs, *, head_dim_even,
                   block_bytes=2 * 1024 * 1024, lane_target=2048,
                   inplace=False):
    R, W = t_flat.shape
    itemsize = t_flat.dtype.itemsize

    # ---- lane tile: big even multiple of 128 (pairs never straddle a tile) --
    if head_dim_even and W % 128 == 0:
        tw = _divisor_tile(W, lane_target, 128)
    else:
        # TODO(synk): for pathologically large W with W % 128 != 0 (or odd D),
        # fall back to a (B*H*S, D) layout instead of full-width rows.
        tw = W
    # Pair-boundary safety contract for the roll wrap-around.
    assert tw == W or (head_dim_even and tw % 2 == 0 and tw % 128 == 0), \
        "lane tile must be the full flat width or an even multiple of 128"

    # ---- row tile: explicit per-block byte budget (no silent VMEM blowup) --
    budget_rows = block_bytes // max(1, tw * itemsize)
    tr = _divisor_tile(R, budget_rows, 8)
    # v7x (2 TCs): when the lane axis has only one block, make sure the row
    # axis has >= 2 blocks so both TensorCores get work.
    if W == tw and R >= 16 and R % 8 == 0 and R // tr < 2:
        tr = _divisor_tile(R, R // 2, 8)

    # ---- grid: lane tiles lead (parallel across cores); rows inner so the
    #      (3, tw) stripe block index is constant and stays resident. --------
    if W // tw >= 2:
        grid = (W // tw, R // tr)
        t_map = lambda j, i: (i, j)
        cs_map = lambda j, i: (0, j)
        o_map = lambda j, i: (i, j)
    else:
        grid = (R // tr, 1)
        t_map = lambda i, j: (i, j)
        cs_map = lambda i, j: (0, j)   # constant -> fetched once
        o_map = lambda i, j: (i, j)

    # ---- VMEM budget: double-buffered in+out blocks + stripe + f32 temps ---
    block_b = tr * tw * itemsize
    stripe_b = 3 * tw * cs.dtype.itemsize
    f32_tmp = 4 * tr * tw * 4        # x, two rolls, pre-cast output (conservative)
    need = 4 * block_b + 2 * stripe_b + f32_tmp + (2 << 20)
    # >= v5e's 16 MiB scoped default, <= 48 MiB (safe under v7x's 64 MiB phys).
    vmem_limit = int(min(max(need, 16 << 20), 48 << 20))

    return pl.pallas_call(
        _rotary_flat_kernel,
        out_shape=jax.ShapeDtypeStruct((R, W), t_flat.dtype),
        grid=grid,
        in_specs=[
            pl.BlockSpec((tr, tw), t_map),
            pl.BlockSpec((3, tw), cs_map),
        ],
        out_specs=pl.BlockSpec((tr, tw), o_map),
        input_output_aliases=({0: 0} if inplace else {}),
        compiler_params=pltpu.CompilerParams(
            dimension_semantics=("parallel", "parallel"),
            vmem_limit_bytes=vmem_limit),
    )(t_flat, cs)


# --------------------------------------------------------------------------- #
# Module
# --------------------------------------------------------------------------- #
class RotaryEmbedding:
    """JAX/Pallas port of the torch RotaryEmbedding module (forward semantics)."""

    def __init__(self, dim, theta=10000, interpolate_factor=1.0,
                 cache_max_seq_len=8192):
        self.dim = dim
        self.theta = theta
        self.interpolate_factor = interpolate_factor
        self.cache_max_seq_len = cache_max_seq_len
        # freqs_ = 1 / theta ** (arange(0, dim, 2) / dim)
        self.freqs = 1.0 / theta ** (
            jnp.arange(0, dim, 2, dtype=jnp.float32) / dim)
        self._stripe_cache = {}
        self._precompute(cache_max_seq_len)

    def _forward(self, seq_len):
        seq = jnp.arange(seq_len, dtype=jnp.float32) / self.interpolate_factor
        thetas = jnp.einsum("s,f->sf", seq, self.freqs)
        return jnp.repeat(thetas, 2, axis=-1)            # (seq_len, rot_dim)

    def _precompute(self, max_seq_len):
        thetas = self._forward(max_seq_len)
        self.cached_cos = jnp.cos(thetas)
        self.cached_sin = jnp.sin(thetas)
        self._stripe_cache.clear()                       # cache depends on these

    def _folded_stripes(self, offset, S, D, dtype):
        """(3, S*D) stacked [cos; sin_e; sin_o] in `dtype`, with rotate_half's
        sign, the even/odd interleave and the pass-through tail folded in.
        Cached per (offset, S, D, dtype) so the fold graph / HBM upload is not
        rebuilt every call."""
        key = (int(offset), int(S), int(D), jnp.dtype(dtype).name)
        cs = self._stripe_cache.get(key)
        if cs is not None:
            return cs

        rot_dim = self.cached_cos.shape[-1]
        cos = self.cached_cos[offset:offset + S].astype(jnp.float32)   # (S, rot)
        sin = self.cached_sin[offset:offset + S].astype(jnp.float32)

        # Interleaved rotate_half folded into per-position factors:
        #   out[d even] = x[d]*cos[d] - x[d+1]*sin[d]
        #   out[d odd ] = x[d]*cos[d] + x[d-1]*sin[d]
        d_even = (jnp.arange(rot_dim) % 2) == 0
        sin_e = jnp.where(d_even, -sin, 0.0)
        sin_o = jnp.where(d_even, 0.0, sin)

        # Pass-through tail (d >= rot_dim): cos = 1, sin_e = sin_o = 0.
        if rot_dim < D:
            tail = D - rot_dim
            cos = jnp.concatenate([cos, jnp.ones((S, tail), jnp.float32)], -1)
            sin_e = jnp.concatenate([sin_e, jnp.zeros((S, tail), jnp.float32)], -1)
            sin_o = jnp.concatenate([sin_o, jnp.zeros((S, tail), jnp.float32)], -1)

        cs = jnp.stack(
            [cos.reshape(-1), sin_e.reshape(-1), sin_o.reshape(-1)],
            axis=0).astype(dtype)                                      # (3, S*D)
        cs = jax.block_until_ready(cs)
        if len(self._stripe_cache) > 64:
            self._stripe_cache.clear()
        self._stripe_cache[key] = cs
        return cs

    def rotate_queries_or_keys(self, t, offset=0, inplace=False):
        # t: (B, H, S, D); seq_dim == -2 as in the torch module.
        B, H, S, D = t.shape
        # Validate offset + S against the cache (regrow like the torch module).
        if offset + S > self.cache_max_seq_len:
            self.cache_max_seq_len = (offset + S) * 2
            self._precompute(self.cache_max_seq_len)

        rot_dim = self.cached_cos.shape[-1]
        assert rot_dim <= D

        cs = self._folded_stripes(offset, S, D, t.dtype)

        R, W = B * H, S * D
        t_flat = t.reshape(R, W)                         # lane-dense layout
        out = _rotary_pallas(t_flat, cs,
                             head_dim_even=(D % 2 == 0),
                             inplace=inplace)
        return out.reshape(B, H, S, D)


# --------------------------------------------------------------------------- #
# Pure-JAX reference (mirror of the torch code)
# --------------------------------------------------------------------------- #
def _rotate_half_ref(x):
    xr = x.reshape(*x.shape[:-1], -1, 2)
    x1, x2 = xr[..., 0], xr[..., 1]
    y = jnp.stack((-x2, x1), axis=-1)
    return y.reshape(*x.shape[:-1], -1)


def _apply_rotary_ref(cos, sin, t):
    rot_dim = cos.shape[-1]
    t_left, t_right = t[..., :rot_dim], t[..., rot_dim:]
    t_tr = t_left * cos + _rotate_half_ref(t_left) * sin
    return jnp.concatenate([t_tr, t_right], axis=-1).astype(t.dtype)


if __name__ == "__main__":
    key = jax.random.PRNGKey(0)
    k1, k2, k3 = jax.random.split(key, 3)

    # Case 1: rotary dim < head dim, nonzero offset (partial rotation + tail).
    B, H, S, D = 2, 4, 8, 32
    rotary_dim, offset = 16, 2
    rope = RotaryEmbedding(rotary_dim, theta=10000, interpolate_factor=1.0,
                           cache_max_seq_len=64)
    t = jax.random.normal(k1, (B, H, S, D), dtype=jnp.float32)
    out = jax.block_until_ready(rope.rotate_queries_or_keys(t, offset=offset))
    ref = _apply_rotary_ref(rope.cached_cos[offset:offset + S],
                            rope.cached_sin[offset:offset + S], t)
    np.testing.assert_allclose(np.asarray(out), np.asarray(ref),
                               rtol=1e-5, atol=1e-5)
    # Second call exercises the folded-stripe cache path.
    out_b = jax.block_until_ready(rope.rotate_queries_or_keys(t, offset=offset))
    np.testing.assert_allclose(np.asarray(out_b), np.asarray(ref),
                               rtol=1e-5, atol=1e-5)

    # Case 2: rotary dim == head dim, D = 128 (wide lane-dense path).
    B2, H2, S2, D2 = 2, 2, 16, 128
    rope2 = RotaryEmbedding(D2, theta=10000, interpolate_factor=1.0,
                            cache_max_seq_len=32)
    t2 = jax.random.normal(k2, (B2, H2, S2, D2), dtype=jnp.float32)
    out2 = jax.block_until_ready(rope2.rotate_queries_or_keys(t2, offset=0))
    ref2 = _apply_rotary_ref(rope2.cached_cos[:S2], rope2.cached_sin[:S2], t2)
    np.testing.assert_allclose(np.asarray(out2), np.asarray(ref2),
                               rtol=1e-5, atol=1e-5)

    # Case 3: multi-tile lane axis (W // tw >= 2) + resident stripe block.
    B3, H3, S3, D3 = 2, 8, 64, 64
    rope3 = RotaryEmbedding(D3, theta=10000, interpolate_factor=1.0,
                            cache_max_seq_len=64)
    t3 = jax.random.normal(k3, (B3, H3, S3, D3), dtype=jnp.float32)
    out3 = jax.block_until_ready(rope3.rotate_queries_or_keys(t3, offset=0))
    ref3 = _apply_rotary_ref(rope3.cached_cos[:S3], rope3.cached_sin[:S3], t3)
    np.testing.assert_allclose(np.asarray(out3), np.asarray(ref3),
                               rtol=1e-5, atol=1e-5)

    print("KERNEL_OK")
</pallas_src>

<mosaic_0001>
module attributes {stable_mosaic.version = 11 : i64} {
  func.func @_rotary_flat_kernel(%arg0: i32, %arg1: i32, %arg2: memref<8x256xf32, #tpu.memory_space<vmem>>, %arg3: memref<3x256xf32, #tpu.memory_space<vmem>>, %arg4: memref<8x256xf32, #tpu.memory_space<vmem>>) attributes {dimension_semantics = [#tpu.dimension_semantics<parallel>, #tpu.dimension_semantics<parallel>], iteration_bounds = array<i64: 1, 1>, scalar_prefetch = 0 : i64, scratch_operands = 0 : i64, tpu.core_type = #tpu.core_type<tc>, window_params = [{transform_indices = @transform_0, window_bounds = array<i64: 8, 256>}, {transform_indices = @transform_1, window_bounds = array<i64: 3, 256>}, {transform_indices = @transform_2, window_bounds = array<i64: 8, 256>}]} {
    %c0 = arith.constant 0 : index
    %c0_0 = arith.constant 0 : index
    %0 = vector.load %arg2[%c0, %c0_0] : memref<8x256xf32, #tpu.memory_space<vmem>>, vector<8x256xf32>
    %c0_1 = arith.constant 0 : index
    %c0_2 = arith.constant 0 : index
    %1 = vector.load %arg3[%c0_1, %c0_2] : memref<3x256xf32, #tpu.memory_space<vmem>>, vector<3x256xf32>
    %c255_i32 = arith.constant 255 : i32
    %2 = tpu.dynamic_rotate %0 by %c255_i32 dim 1 : vector<8x256xf32>, i32 -> vector<8x256xf32>
    %c1_i32 = arith.constant 1 : i32
    %3 = tpu.dynamic_rotate %0 by %c1_i32 dim 1 : vector<8x256xf32>, i32 -> vector<8x256xf32>
    %4 = vector.extract_strided_slice %1 {offsets = [0, 0], sizes = [1, 256], strides = [1, 1]} : vector<3x256xf32> to vector<1x256xf32>
    %5 = vector.broadcast %4 : vector<1x256xf32> to vector<8x256xf32>
    %6 = arith.mulf %0, %5 : vector<8x256xf32>
    %7 = vector.extract_strided_slice %1 {offsets = [1, 0], sizes = [1, 256], strides = [1, 1]} : vector<3x256xf32> to vector<1x256xf32>
    %8 = vector.broadcast %7 : vector<1x256xf32> to vector<8x256xf32>
    %9 = arith.mulf %2, %8 : vector<8x256xf32>
    %10 = arith.addf %6, %9 : vector<8x256xf32>
    %11 = vector.extract_strided_slice %1 {offsets = [2, 0], sizes = [1, 256], strides = [1, 1]} : vector<3x256xf32> to vector<1x256xf32>
    %12 = vector.broadcast %11 : vector<1x256xf32> to vector<8x256xf32>
    %13 = arith.mulf %3, %12 : vector<8x256xf32>
    %14 = arith.addf %10, %13 : vector<8x256xf32>
    %c0_3 = arith.constant 0 : index
    %c0_4 = arith.constant 0 : index
    %15 = vector.load %arg4[%c0_3, %c0_4] : memref<8x256xf32, #tpu.memory_space<vmem>>, vector<8x256xf32>
    tpu.vector_store %arg4[%c0_3, %c0_4], %14 {strides = array<i32>} : memref<8x256xf32, #tpu.memory_space<vmem>>, vector<8x256xf32>,
    return
  }
  func.func @transform_0(%arg0: i32, %arg1: i32) -> (i32, i32) {
    %c0_i32 = arith.constant 0 : i32
    return %arg0, %arg1 : i32, i32
  }
  func.func @transform_1(%arg0: i32, %arg1: i32) -> (i32, i32) {
    %c0_i32 = arith.constant 0 : i32
    %c0_i32_0 = arith.constant 0 : i32
    return %c0_i32, %arg1 : i32, i32
  }
  func.func @transform_2(%arg0: i32, %arg1: i32) -> (i32, i32) {
    %c0_i32 = arith.constant 0 : i32
    return %arg0, %arg1 : i32, i32
  }
}

</mosaic_0001>

<bundles_post_ra>
// kernel: tpu_custom_call.1
= control target key start
LH: loop header
LB: loop body
LE: loop exit
PB: predicated region body
PF: predicated region fallthrough
CT: control target
= control target key end

     0   :  { %7 = vsyncpa [#allocation3], 0  ;;  %s238_s0 = inlined_call_operand.hbm [shape: f32[8,256], index: 0, kind: input, shape index: {}]   ;;  %s239_s1 = inlined_call_operand.hbm [shape: f32[3,256], index: 1, kind: input, shape index: {}]   ;;  %s240_s2 = inlined_call_operand.hbm [shape: f32[8,256], index: 2, kind: output, shape index: {}]  }
   0x1   :  { %8 = vsyncpa [#allocation6], 0 }
   0x2   :  { %9 = vsyncpa [#allocation4], 0  ;;  %s209_s9 = smov [#allocation2]   ;;  %s210_s11 = smov [#allocation5]  }
   0x3   :  { %s16_s10 = sshll.u32 %s209_s9, 4  ;;  %s26_s12 = sshll.u32 %s210_s11, 4  ;;  %s17_s10 = int_to_ptr.vmem [resolvable:$true] %s16_s10  ;;  %s27_s12 = int_to_ptr.vmem [resolvable:$true] %s26_s12 }
   0x4   :  { %s151_s13 = scalar_lea.vmem %s17_s10, 256  ;;  %p156_p1 = scmp.lt.s32.totalorder %s17_s10, %s17_s10 }
   0x5   :  { %p152_p0 = scmp.ne.s32.totalorder %s17_s10, %s151_s13  ;;  %p157_p2 = scmp.lt.s32.totalorder %s151_s13, %s151_s13 }
   0x7   :  { %p158_p3 = por %p157_p2, %p156_p1 }
   0x9   :  { %p159_p4 = pnand %p158_p3, %p152_p0 }
   0xb   :  { %162 = shalt.err (!%p159_p4)
}
   0xc   :  { %19 = dma.hbm_to_vmem [thread:$0]  %s238_s0, 256, %s17_s10, [#allocation3]  }
   0xd   :  { %s171_s16 = scalar_lea.vmem %s27_s12, 128  ;;  %p176_p6 = scmp.lt.s32.totalorder %s27_s12, %s27_s12 }
   0xe   :  { %p172_p5 = scmp.ne.s32.totalorder %s27_s12, %s171_s16  ;;  %p177_p7 = scmp.lt.s32.totalorder %s171_s16, %s171_s16 }
  0x10   :  { %p178_p8 = por %p177_p7, %p176_p6 }
  0x12   :  { %p179_p9 = pnand %p178_p8, %p172_p5 }
  0x14   :  { %182 = shalt.err (!%p179_p9)
}
  0x15   :  { %29 = dma.hbm_to_vmem [thread:$0]  %s239_s1, 128, %s27_s12, [#allocation6]  }
  0x16   :  { %203 = dma.done.wait [#allocation3], 256  }
  0x17   :  { %204 = vsyncadd [#allocation3], 4294967040 }
  0x18   :  { %205 = dma.done.wait [#allocation6], 128  }
  0x19   :  { %206 = vsyncadd [#allocation6], 4294967168  ;;  %v36_v0 = vld [vmem:[#allocation2] sm:$0xff]  ;;  %s211_s19 = smov 1   ;;  %s212_s20 = smov 127   ;;  %v37_v1 = vld [vmem:[#allocation2 + $0x8] sm:$0xff]  ;;  %v43_v2 = vlaneseq }
  0x1a   :  { %48 = vrot.lane.b32.xlu1 %v36_v0, %s211_s19  ;;  %39 = vrot.lane.b32.xlu0 %v36_v0, %s212_s20  ;;  %v38_v6 = vld [vmem:[#allocation5] sm:$0x77]  ;;  %s213_s0 = smov [#allocation7]  }
  0x1b   :  { %v57_v3 = vshrl.u32 %v43_v2, 7  ;;  %v44_v13 = vand.u32 127, %v43_v2  ;;  %s128_s1 = sshll.u32 %s213_s0, 4  ;;  %s129_s1 = int_to_ptr.vmem [resolvable:$true] %s128_s1 }
  0x1c   :  { %s183_s21 = scalar_lea.vmem %s129_s1, 256  ;;  %p188_p11 = scmp.lt.s32.totalorder %s129_s1, %s129_s1 }
  0x1d   :  { %v58_v4 = vsub.s32 0, %v57_v3  ;;  %v62_v5 = vsub.s32 4, %v57_v3  ;;  %v78_v7 = vsub.s32 1, %v57_v3  ;;  %v82_v8 = vsub.s32 5, %v57_v3  ;;  %p184_p10 = scmp.ne.s32.totalorder %s129_s1, %s183_s21  ;;  %p189_p12 = scmp.lt.s32.totalorder %s183_s21, %s183_s21 }
  0x1e   :  { %50 = vrot.lane.b32.xlu1 %v37_v1, %s211_s19  ;;  %41 = vrot.lane.b32.xlu0 %v37_v1, %s212_s20  ;;  %v100_v11 = vsub.s32 2, %v57_v3  ;;  %v104_v12 = vsub.s32 6, %v57_v3  ;;  %vm52_vm0 = vcmp.lt.s32.totalorder %v44_v13, 1  ;;  %vm45_vm1 = vcmp.lt.s32.totalorder %v44_v13, 127 }
  0x1f   :  { %v59_v9 = vrot.slane %v38_v6, %v58_v4  ;;  %v63_v10 = vrot.slane %v38_v6, %v62_v5  ;;  %v79_v14 = vrot.slane %v38_v6, %v78_v7  ;;  %v83_v15 = vrot.slane %v38_v6, %v82_v8  ;;  %p190_p13 = por %p189_p12, %p188_p11 }
  0x20   :  { %v101_v20 = vrot.slane %v38_v6, %v100_v11  ;;  %v105_v21 = vrot.slane %v38_v6, %v104_v12 }
  0x21   :  { %v69_v16 = vrot.slane %v59_v9, %v58_v4  ;;  %v73_v17 = vrot.slane %v63_v10, %v58_v4  ;;  %v89_v22 = vrot.slane %v79_v14, %v78_v7  ;;  %v93_v23 = vrot.slane %v83_v15, %v78_v7  ;;  %p191_p0 = pnand %p190_p13, %p184_p10 }
  0x22   :  { %v111_v26 = vrot.slane %v101_v20, %v100_v11  ;;  %v115_v27 = vrot.slane %v105_v21, %v100_v11 }
  0x23   :  { %v74_v24 = vmul.f32 %v69_v16, %v36_v0  ;;  %v75_v25 = vmul.f32 %v73_v17, %v37_v1 }
  0x8c   :  { %v49_v18 = vpop.permute.xlu1 %48  ;;  %v40_v19 = vpop.permute.xlu0 %39 }
  0x90   :  { %v51_v28 = vpop.permute.xlu1 %50  ;;  %v42_v29 = vpop.permute.xlu0 %41 }
  0x91   :  { %v53_v30 = vsel %vm52_vm0, %v49_v18, %v51_v28  ;;  %v54_v31 = vsel %vm52_vm0, %v51_v28, %v49_v18  ;;  %v46_v32 = vsel %vm45_vm1, %v40_v19, %v42_v29  ;;  %v47_v33 = vsel %vm45_vm1, %v42_v29, %v40_v19 }
  0x92   :  { %v94_v34 = vmul.f32 %v89_v22, %v46_v32  ;;  %v95_v35 = vmul.f32 %v93_v23, %v47_v33  ;;  %v116_v36 = vmul.f32 %v111_v26, %v54_v31  ;;  %v117_v37 = vmul.f32 %v115_v27, %v53_v30 }
  0x94   :  { %v96_v38 = vadd.f32 %v94_v34, %v74_v24  ;;  %v97_v39 = vadd.f32 %v95_v35, %v75_v25 }
  0x96   :  { %v118_v40 = vadd.f32 %v116_v36, %v96_v38  ;;  %v119_v41 = vadd.f32 %v117_v37, %v97_v39 }
  0x98   :  { %120 = vst [vmem:[#allocation7] sm:$0xff] %v118_v40  ;;  %121 = vst [vmem:[#allocation7 + $0x8] sm:$0xff] %v119_v41 }
  0x99   :  { %194 = shalt.err (!%p191_p0)
}
  0x9a   :  { %131 = dma.vmem_to_hbm [thread:$0]  %s129_s1, 256, %s240_s2, [#allocation4]  }
  0x9b   :  { %207 = dma.done.wait [#allocation4], 256  }
  0x9c   :  { %208 = vsyncadd [#allocation4], 4294967040 }
  0x9d   :  { %135 = vsyncpa [#allocation3], 1 }
  0x9e   :  { %136 = vsyncpa [#allocation6], 1 }
  0x9f   :  { %137 = vsyncpa [#allocation4], 1 }

</bundles_post_ra>
